<compile_context>
chip_gen: v7x
topology: tpu7x:2x2x1
jax: 0.10.0
libtpu: 0.0.40
codegen_flags: <defaults>
</compile_context>

<pallas_src>
import functools
import math

import jax
import jax.numpy as jnp
from jax.experimental import pallas as pl
from jax.experimental.pallas import tpu as pltpu  # noqa: F401  (not needed at this size)


# ----------------------------------------------------------------------------
# Fused MHA kernel: whole batch in one invocation (no grid).
# ----------------------------------------------------------------------------
def mha_fused_kernel(xq_ref, xk_ref, xv_ref,
                     wq_ref, wk_ref, wv_ref,
                     bq_ref, bk_ref, bv_ref,
                     wo_ref, bo_ref,
                     o_ref, *, batch, seqlen):
    # xq/xk/xv : (B*S, D)
    # wq/wk/wv : (H, D, dk)   per-head, pre-transposed (x @ w); wq pre-scaled by 1/sqrt(dk)
    # bq/bk/bv : (H, 1, dk)   bq pre-scaled by 1/sqrt(dk)
    # wo       : (H, dk, D)   bo : (1, D)
    # o        : (B*S, D)
    f32 = jnp.float32
    BS, D = xq_ref.shape
    H, _, dk = wq_ref.shape

    xq = xq_ref[...]
    xk = xk_ref[...]
    xv = xv_ref[...]

    # Accumulator initialised with the output bias (drops the epilogue add).
    acc = jnp.broadcast_to(bo_ref[...], (BS, D)).astype(f32)

    # H is small -> static unroll.  No lane slicing anywhere: each head's
    # projections use contiguous pre-split weights on the (mostly idle) MXU.
    for hh in range(H):
        q = jnp.dot(xq, wq_ref[hh], preferred_element_type=f32) + bq_ref[hh]   # (BS, dk)
        k = jnp.dot(xk, wk_ref[hh], preferred_element_type=f32) + bk_ref[hh]
        v = jnp.dot(xv, wv_ref[hh], preferred_element_type=f32) + bv_ref[hh]

        # Leading-dim split only (second-minor dim splits on a sublane-tile
        # boundary) -> no data relayout.
        q3 = q.reshape(batch, seqlen, dk)
        k3 = k.reshape(batch, seqlen, dk)
        v3 = v.reshape(batch, seqlen, dk)

        # Scores (scale already folded into wq/bq) + softmax, batched over B.
        s = jnp.einsum("bqd,bkd->bqk", q3, k3, preferred_element_type=f32)      # (B,S,S)
        s = s - jnp.max(s, axis=-1, keepdims=True)
        e = jnp.exp(s)
        p = e * pl.reciprocal(jnp.sum(e, axis=-1, keepdims=True), approx=False)

        ctx = jnp.einsum("bqk,bkd->bqd", p, v3, preferred_element_type=f32)     # (B,S,dk)

        # Head merge folded into the output projection: ctx_h @ wo_h[h].
        acc = acc + jnp.dot(ctx.reshape(BS, dk), wo_ref[hh],
                            preferred_element_type=f32)

    o_ref[...] = acc.astype(o_ref.dtype)


# ----------------------------------------------------------------------------
# One-time parameter preparation (hoisted out of the forward path).
# ----------------------------------------------------------------------------
def prepare_fused_params(params, *, h):
    """torch-layout params -> kernel-layout params (run once, not per call)."""
    d_model = params["wq"].shape[0]
    dk = d_model // h
    scale = 1.0 / math.sqrt(dk)

    def per_head_cols(w):
        # torch Linear weight w: (out, in);  y = x @ w.T.
        # -> (h, in, dk) with w_h[hh][:, d] == w.T[:, hh*dk + d]
        return w.T.reshape(d_model, h, dk).transpose(1, 0, 2)

    return {
        # Softmax scale folded into the query projection weights/bias.
        "wq_h": per_head_cols(params["wq"]) * scale,
        "wk_h": per_head_cols(params["wk"]),
        "wv_h": per_head_cols(params["wv"]),
        "bq_h": params["bq"].reshape(h, 1, dk) * scale,
        "bk_h": params["bk"].reshape(h, 1, dk),
        "bv_h": params["bv"].reshape(h, 1, dk),
        # wo_h[hh, d, o] = wo[o, hh*dk + d]  (head-split of Wo^T)
        "wo_h": params["wo"].T.reshape(h, dk, d_model),
        "bo": params["bo"].reshape(1, d_model),
    }


# ----------------------------------------------------------------------------
# Fused MHA forward (inference / eval mode: dropout = identity, mask = None)
# ----------------------------------------------------------------------------
def multi_head_attention(query, key, value, fused, *, h):
    B, S, D = query.shape
    BS = B * S

    kernel = functools.partial(mha_fused_kernel, batch=B, seqlen=S)

    # (B, S, D) -> (B*S, D) are free row-major metadata reshapes; everything
    # fits in VMEM, so no grid / BlockSpec tiling is needed at this size.
    out2d = pl.pallas_call(
        kernel,
        out_shape=jax.ShapeDtypeStruct((BS, D), query.dtype),
    )(query.reshape(BS, D), key.reshape(BS, D), value.reshape(BS, D),
      fused["wq_h"], fused["wk_h"], fused["wv_h"],
      fused["bq_h"], fused["bk_h"], fused["bv_h"],
      fused["wo_h"], fused["bo"])
    return out2d.reshape(B, S, D)


# ----------------------------------------------------------------------------
# Deterministic parameter init (mimics nn.Linear uniform(-1/sqrt(in), 1/sqrt(in)))
# ----------------------------------------------------------------------------
def init_params(key, d_model):
    bound = 1.0 / math.sqrt(d_model)
    names = ["wq", "bq", "wk", "bk", "wv", "bv", "wo", "bo"]
    keys = jax.random.split(key, len(names))
    params = {}
    for n, k in zip(names, keys):
        if n.startswith("w"):
            params[n] = jax.random.uniform(
                k, (d_model, d_model), jnp.float32, -bound, bound)
        else:
            params[n] = jax.random.uniform(
                k, (d_model,), jnp.float32, -bound, bound)
    return params


# ----------------------------------------------------------------------------
# Pure-JAX reference for a correctness check
# ----------------------------------------------------------------------------
def reference_mha(query, key, value, params, *, h):
    B, S, d_model = query.shape
    d_k = d_model // h

    def lin(x, w, b):
        return x @ w.T + b

    def split(x):
        return x.reshape(B, S, h, d_k).transpose(0, 2, 1, 3)

    q = split(lin(query, params["wq"], params["bq"]))
    k = split(lin(key,   params["wk"], params["bk"]))
    v = split(lin(value, params["wv"], params["bv"]))
    s = jnp.einsum("bhqd,bhkd->bhqk", q, k) / math.sqrt(d_k)
    p = jax.nn.softmax(s, axis=-1)
    x = jnp.einsum("bhqk,bhkd->bhqd", p, v)
    x = x.transpose(0, 2, 1, 3).reshape(B, S, d_model)
    return lin(x, params["wo"], params["bo"])


if __name__ == "__main__":
    B, S, H, D_MODEL = 2, 8, 4, 32   # d_k = 8

    root = jax.random.PRNGKey(0)
    kq, kk, kv, kp = jax.random.split(root, 4)
    q = jax.random.normal(kq, (B, S, D_MODEL), jnp.float32)
    k = jax.random.normal(kk, (B, S, D_MODEL), jnp.float32)
    v = jax.random.normal(kv, (B, S, D_MODEL), jnp.float32)
    params = init_params(kp, D_MODEL)

    # One-time weight re-layout (outside the forward path).
    fused = prepare_fused_params(params, h=H)
    fused = jax.tree_util.tree_map(jax.block_until_ready, fused)

    # TODO(synk): dropout (p=0.1) on attention probs omitted (eval-mode identity);
    # training parity would require pltpu.prng_seed/prng_random_bits in-kernel.
    # TODO(synk): attn_mask is unsupported; only the mask=None path is implemented.
    out = multi_head_attention(q, k, v, fused, h=H)
    out = jax.block_until_ready(out)

    ref = reference_mha(q, k, v, params, h=H)
    assert out.shape == (B, S, D_MODEL)
    assert jnp.allclose(out, ref, atol=1e-4, rtol=1e-4), "mismatch vs reference"

    print("KERNEL_OK")
</pallas_src>

<mosaic_0001>
module attributes {stable_mosaic.version = 11 : i64} {
  func.func @mha_fused_kernel(%arg0: memref<16x32xf32, #tpu.memory_space<vmem>>, %arg1: memref<16x32xf32, #tpu.memory_space<vmem>>, %arg2: memref<16x32xf32, #tpu.memory_space<vmem>>, %arg3: memref<4x32x8xf32, #tpu.memory_space<vmem>>, %arg4: memref<4x32x8xf32, #tpu.memory_space<vmem>>, %arg5: memref<4x32x8xf32, #tpu.memory_space<vmem>>, %arg6: memref<4x1x8xf32, #tpu.memory_space<vmem>>, %arg7: memref<4x1x8xf32, #tpu.memory_space<vmem>>, %arg8: memref<4x1x8xf32, #tpu.memory_space<vmem>>, %arg9: memref<4x8x32xf32, #tpu.memory_space<vmem>>, %arg10: memref<1x32xf32, #tpu.memory_space<vmem>>, %arg11: memref<16x32xf32, #tpu.memory_space<vmem>>) attributes {dimension_semantics = [], scalar_prefetch = 0 : i64, scratch_operands = 0 : i64, tpu.core_type = #tpu.core_type<tc>} {
    %c0 = arith.constant 0 : index
    %c0_0 = arith.constant 0 : index
    %0 = vector.load %arg0[%c0, %c0_0] : memref<16x32xf32, #tpu.memory_space<vmem>>, vector<16x32xf32>
    %c0_1 = arith.constant 0 : index
    %c0_2 = arith.constant 0 : index
    %1 = vector.load %arg1[%c0_1, %c0_2] : memref<16x32xf32, #tpu.memory_space<vmem>>, vector<16x32xf32>
    %c0_3 = arith.constant 0 : index
    %c0_4 = arith.constant 0 : index
    %2 = vector.load %arg2[%c0_3, %c0_4] : memref<16x32xf32, #tpu.memory_space<vmem>>, vector<16x32xf32>
    %c0_5 = arith.constant 0 : index
    %c0_6 = arith.constant 0 : index
    %3 = vector.load %arg10[%c0_5, %c0_6] : memref<1x32xf32, #tpu.memory_space<vmem>>, vector<1x32xf32>
    %4 = vector.shape_cast %3 : vector<1x32xf32> to vector<1x32xf32>
    %5 = vector.broadcast %4 : vector<1x32xf32> to vector<16x32xf32>
    %c0_7 = arith.constant 0 : index
    %c0_8 = arith.constant 0 : index
    %c0_9 = arith.constant 0 : index
    %6 = vector.load %arg3[%c0_7, %c0_8, %c0_9] : memref<4x32x8xf32, #tpu.memory_space<vmem>>, vector<1x32x8xf32>
    %7 = vector.shape_cast %6 : vector<1x32x8xf32> to vector<32x8xf32>
    %cst = arith.constant dense<0.000000e+00> : vector<16x8xf32>
    %8 = tpu.matmul %0, %7, %cst {dimension_numbers = #tpu.dot_dimension_numbers<[1], [0], [0], [1], [0, 0, 1, 1], [], []>} : vector<16x32xf32>, vector<32x8xf32>, vector<16x8xf32> -> vector<16x8xf32>
    %c0_10 = arith.constant 0 : index
    %c0_11 = arith.constant 0 : index
    %c0_12 = arith.constant 0 : index
    %9 = vector.load %arg6[%c0_10, %c0_11, %c0_12] : memref<4x1x8xf32, #tpu.memory_space<vmem>>, vector<1x1x8xf32>
    %10 = vector.shape_cast %9 : vector<1x1x8xf32> to vector<1x8xf32>
    %11 = vector.broadcast %10 : vector<1x8xf32> to vector<16x8xf32>
    %12 = arith.addf %8, %11 : vector<16x8xf32>
    %c0_13 = arith.constant 0 : index
    %c0_14 = arith.constant 0 : index
    %c0_15 = arith.constant 0 : index
    %13 = vector.load %arg4[%c0_13, %c0_14, %c0_15] : memref<4x32x8xf32, #tpu.memory_space<vmem>>, vector<1x32x8xf32>
    %14 = vector.shape_cast %13 : vector<1x32x8xf32> to vector<32x8xf32>
    %cst_16 = arith.constant dense<0.000000e+00> : vector<16x8xf32>
    %15 = tpu.matmul %1, %14, %cst_16 {dimension_numbers = #tpu.dot_dimension_numbers<[1], [0], [0], [1], [0, 0, 1, 1], [], []>} : vector<16x32xf32>, vector<32x8xf32>, vector<16x8xf32> -> vector<16x8xf32>
    %c0_17 = arith.constant 0 : index
    %c0_18 = arith.constant 0 : index
    %c0_19 = arith.constant 0 : index
    %16 = vector.load %arg7[%c0_17, %c0_18, %c0_19] : memref<4x1x8xf32, #tpu.memory_space<vmem>>, vector<1x1x8xf32>
    %17 = vector.shape_cast %16 : vector<1x1x8xf32> to vector<1x8xf32>
    %18 = vector.broadcast %17 : vector<1x8xf32> to vector<16x8xf32>
    %19 = arith.addf %15, %18 : vector<16x8xf32>
    %c0_20 = arith.constant 0 : index
    %c0_21 = arith.constant 0 : index
    %c0_22 = arith.constant 0 : index
    %20 = vector.load %arg5[%c0_20, %c0_21, %c0_22] : memref<4x32x8xf32, #tpu.memory_space<vmem>>, vector<1x32x8xf32>
    %21 = vector.shape_cast %20 : vector<1x32x8xf32> to vector<32x8xf32>
    %cst_23 = arith.constant dense<0.000000e+00> : vector<16x8xf32>
    %22 = tpu.matmul %2, %21, %cst_23 {dimension_numbers = #tpu.dot_dimension_numbers<[1], [0], [0], [1], [0, 0, 1, 1], [], []>} : vector<16x32xf32>, vector<32x8xf32>, vector<16x8xf32> -> vector<16x8xf32>
    %c0_24 = arith.constant 0 : index
    %c0_25 = arith.constant 0 : index
    %c0_26 = arith.constant 0 : index
    %23 = vector.load %arg8[%c0_24, %c0_25, %c0_26] : memref<4x1x8xf32, #tpu.memory_space<vmem>>, vector<1x1x8xf32>
    %24 = vector.shape_cast %23 : vector<1x1x8xf32> to vector<1x8xf32>
    %25 = vector.broadcast %24 : vector<1x8xf32> to vector<16x8xf32>
    %26 = arith.addf %22, %25 : vector<16x8xf32>
    %27 = vector.shape_cast %12 : vector<16x8xf32> to vector<2x8x8xf32>
    %28 = vector.shape_cast %19 : vector<16x8xf32> to vector<2x8x8xf32>
    %29 = vector.shape_cast %26 : vector<16x8xf32> to vector<2x8x8xf32>
    "tpu.trace_start"() <{level = 10 : i32, message = "bqd,bkd->bqk"}> : () -> ()
    %cst_27 = arith.constant dense<0.000000e+00> : vector<2x8x8xf32>
    %30 = tpu.matmul %27, %28, %cst_27 {dimension_numbers = #tpu.dot_dimension_numbers<[2], [2], [1], [1], [0, 0, 0, 1, 1, 1], [0], [0]>} : vector<2x8x8xf32>, vector<2x8x8xf32>, vector<2x8x8xf32> -> vector<2x8x8xf32>
    "tpu.trace_stop"() : () -> ()
    %cst_28 = arith.constant dense<0xFF800000> : vector<2x8xf32>
    %31 = vector.multi_reduction <maximumf>, %30, %cst_28 [2] : vector<2x8x8xf32> to vector<2x8xf32>
    %32 = vector.shape_cast %31 : vector<2x8xf32> to vector<2x8x1xf32>
    %33 = vector.broadcast %32 : vector<2x8x1xf32> to vector<2x8x8xf32>
    %34 = arith.subf %30, %33 : vector<2x8x8xf32>
    %35 = math.exp %34 : vector<2x8x8xf32>
    %cst_29 = arith.constant dense<0.000000e+00> : vector<2x8xf32>
    %36 = vector.multi_reduction <add>, %35, %cst_29 [2] : vector<2x8x8xf32> to vector<2x8xf32>
    %37 = vector.shape_cast %36 : vector<2x8xf32> to vector<2x8x1xf32>
    %38 = tpu.reciprocal %37 : vector<2x8x1xf32> -> vector<2x8x1xf32>
    %39 = vector.broadcast %38 : vector<2x8x1xf32> to vector<2x8x8xf32>
    %40 = arith.mulf %35, %39 : vector<2x8x8xf32>
    "tpu.trace_start"() <{level = 10 : i32, message = "bqk,bkd->bqd"}> : () -> ()
    %cst_30 = arith.constant dense<0.000000e+00> : vector<2x8x8xf32>
    %41 = tpu.matmul %40, %29, %cst_30 {dimension_numbers = #tpu.dot_dimension_numbers<[2], [1], [1], [2], [0, 0, 0, 1, 1, 2], [0], [0]>} : vector<2x8x8xf32>, vector<2x8x8xf32>, vector<2x8x8xf32> -> vector<2x8x8xf32>
    "tpu.trace_stop"() : () -> ()
    %42 = vector.shape_cast %41 : vector<2x8x8xf32> to vector<16x8xf32>
    %c0_31 = arith.constant 0 : index
    %c0_32 = arith.constant 0 : index
    %c0_33 = arith.constant 0 : index
    %43 = vector.load %arg9[%c0_31, %c0_32, %c0_33] : memref<4x8x32xf32, #tpu.memory_space<vmem>>, vector<1x8x32xf32>
    %44 = vector.shape_cast %43 : vector<1x8x32xf32> to vector<8x32xf32>
    %cst_34 = arith.constant dense<0.000000e+00> : vector<16x32xf32>
    %45 = tpu.matmul %42, %44, %cst_34 {dimension_numbers = #tpu.dot_dimension_numbers<[1], [0], [0], [1], [0, 0, 1, 1], [], []>} : vector<16x8xf32>, vector<8x32xf32>, vector<16x32xf32> -> vector<16x32xf32>
    %46 = arith.addf %5, %45 : vector<16x32xf32>
    %c1 = arith.constant 1 : index
    %c0_35 = arith.constant 0 : index
    %c0_36 = arith.constant 0 : index
    %47 = vector.load %arg3[%c1, %c0_35, %c0_36] : memref<4x32x8xf32, #tpu.memory_space<vmem>>, vector<1x32x8xf32>
    %48 = vector.shape_cast %47 : vector<1x32x8xf32> to vector<32x8xf32>
    %cst_37 = arith.constant dense<0.000000e+00> : vector<16x8xf32>
    %49 = tpu.matmul %0, %48, %cst_37 {dimension_numbers = #tpu.dot_dimension_numbers<[1], [0], [0], [1], [0, 0, 1, 1], [], []>} : vector<16x32xf32>, vector<32x8xf32>, vector<16x8xf32> -> vector<16x8xf32>
    %c1_38 = arith.constant 1 : index
    %c0_39 = arith.constant 0 : index
    %c0_40 = arith.constant 0 : index
    %50 = vector.load %arg6[%c1_38, %c0_39, %c0_40] : memref<4x1x8xf32, #tpu.memory_space<vmem>>, vector<1x1x8xf32>
    %51 = vector.shape_cast %50 : vector<1x1x8xf32> to vector<1x8xf32>
    %52 = vector.broadcast %51 : vector<1x8xf32> to vector<16x8xf32>
    %53 = arith.addf %49, %52 : vector<16x8xf32>
    %c1_41 = arith.constant 1 : index
    %c0_42 = arith.constant 0 : index
    %c0_43 = arith.constant 0 : index
    %54 = vector.load %arg4[%c1_41, %c0_42, %c0_43] : memref<4x32x8xf32, #tpu.memory_space<vmem>>, vector<1x32x8xf32>
    %55 = vector.shape_cast %54 : vector<1x32x8xf32> to vector<32x8xf32>
    %cst_44 = arith.constant dense<0.000000e+00> : vector<16x8xf32>
    %56 = tpu.matmul %1, %55, %cst_44 {dimension_numbers = #tpu.dot_dimension_numbers<[1], [0], [0], [1], [0, 0, 1, 1], [], []>} : vector<16x32xf32>, vector<32x8xf32>, vector<16x8xf32> -> vector<16x8xf32>
    %c1_45 = arith.constant 1 : index
    %c0_46 = arith.constant 0 : index
    %c0_47 = arith.constant 0 : index
    %57 = vector.load %arg7[%c1_45, %c0_46, %c0_47] : memref<4x1x8xf32, #tpu.memory_space<vmem>>, vector<1x1x8xf32>
    %58 = vector.shape_cast %57 : vector<1x1x8xf32> to vector<1x8xf32>
    %59 = vector.broadcast %58 : vector<1x8xf32> to vector<16x8xf32>
    %60 = arith.addf %56, %59 : vector<16x8xf32>
    %c1_48 = arith.constant 1 : index
    %c0_49 = arith.constant 0 : index
    %c0_50 = arith.constant 0 : index
    %61 = vector.load %arg5[%c1_48, %c0_49, %c0_50] : memref<4x32x8xf32, #tpu.memory_space<vmem>>, vector<1x32x8xf32>
    %62 = vector.shape_cast %61 : vector<1x32x8xf32> to vector<32x8xf32>
    %cst_51 = arith.constant dense<0.000000e+00> : vector<16x8xf32>
    %63 = tpu.matmul %2, %62, %cst_51 {dimension_numbers = #tpu.dot_dimension_numbers<[1], [0], [0], [1], [0, 0, 1, 1], [], []>} : vector<16x32xf32>, vector<32x8xf32>, vector<16x8xf32> -> vector<16x8xf32>
    %c1_52 = arith.constant 1 : index
    %c0_53 = arith.constant 0 : index
    %c0_54 = arith.constant 0 : index
    %64 = vector.load %arg8[%c1_52, %c0_53, %c0_54] : memref<4x1x8xf32, #tpu.memory_space<vmem>>, vector<1x1x8xf32>
    %65 = vector.shape_cast %64 : vector<1x1x8xf32> to vector<1x8xf32>
    %66 = vector.broadcast %65 : vector<1x8xf32> to vector<16x8xf32>
    %67 = arith.addf %63, %66 : vector<16x8xf32>
    %68 = vector.shape_cast %53 : vector<16x8xf32> to vector<2x8x8xf32>
    %69 = vector.shape_cast %60 : vector<16x8xf32> to vector<2x8x8xf32>
    %70 = vector.shape_cast %67 : vector<16x8xf32> to vector<2x8x8xf32>
    "tpu.trace_start"() <{level = 10 : i32, message = "bqd,bkd->bqk"}> : () -> ()
    %cst_55 = arith.constant dense<0.000000e+00> : vector<2x8x8xf32>
    %71 = tpu.matmul %68, %69, %cst_55 {dimension_numbers = #tpu.dot_dimension_numbers<[2], [2], [1], [1], [0, 0, 0, 1, 1, 1], [0], [0]>} : vector<2x8x8xf32>, vector<2x8x8xf32>, vector<2x8x8xf32> -> vector<2x8x8xf32>
    "tpu.trace_stop"() : () -> ()
    %cst_56 = arith.constant dense<0xFF800000> : vector<2x8xf32>
    %72 = vector.multi_reduction <maximumf>, %71, %cst_56 [2] : vector<2x8x8xf32> to vector<2x8xf32>
    %73 = vector.shape_cast %72 : vector<2x8xf32> to vector<2x8x1xf32>
    %74 = vector.broadcast %73 : vector<2x8x1xf32> to vector<2x8x8xf32>
    %75 = arith.subf %71, %74 : vector<2x8x8xf32>
    %76 = math.exp %75 : vector<2x8x8xf32>
    %cst_57 = arith.constant dense<0.000000e+00> : vector<2x8xf32>
    %77 = vector.multi_reduction <add>, %76, %cst_57 [2] : vector<2x8x8xf32> to vector<2x8xf32>
    %78 = vector.shape_cast %77 : vector<2x8xf32> to vector<2x8x1xf32>
    %79 = tpu.reciprocal %78 : vector<2x8x1xf32> -> vector<2x8x1xf32>
    %80 = vector.broadcast %79 : vector<2x8x1xf32> to vector<2x8x8xf32>
    %81 = arith.mulf %76, %80 : vector<2x8x8xf32>
    "tpu.trace_start"() <{level = 10 : i32, message = "bqk,bkd->bqd"}> : () -> ()
    %cst_58 = arith.constant dense<0.000000e+00> : vector<2x8x8xf32>
    %82 = tpu.matmul %81, %70, %cst_58 {dimension_numbers = #tpu.dot_dimension_numbers<[2], [1], [1], [2], [0, 0, 0, 1, 1, 2], [0], [0]>} : vector<2x8x8xf32>, vector<2x8x8xf32>, vector<2x8x8xf32> -> vector<2x8x8xf32>
    "tpu.trace_stop"() : () -> ()
    %83 = vector.shape_cast %82 : vector<2x8x8xf32> to vector<16x8xf32>
    %c1_59 = arith.constant 1 : index
    %c0_60 = arith.constant 0 : index
    %c0_61 = arith.constant 0 : index
    %84 = vector.load %arg9[%c1_59, %c0_60, %c0_61] : memref<4x8x32xf32, #tpu.memory_space<vmem>>, vector<1x8x32xf32>
    %85 = vector.shape_cast %84 : vector<1x8x32xf32> to vector<8x32xf32>
    %cst_62 = arith.constant dense<0.000000e+00> : vector<16x32xf32>
    %86 = tpu.matmul %83, %85, %cst_62 {dimension_numbers = #tpu.dot_dimension_numbers<[1], [0], [0], [1], [0, 0, 1, 1], [], []>} : vector<16x8xf32>, vector<8x32xf32>, vector<16x32xf32> -> vector<16x32xf32>
    %87 = arith.addf %46, %86 : vector<16x32xf32>
    %c2 = arith.constant 2 : index
    %c0_63 = arith.constant 0 : index
    %c0_64 = arith.constant 0 : index
    %88 = vector.load %arg3[%c2, %c0_63, %c0_64] : memref<4x32x8xf32, #tpu.memory_space<vmem>>, vector<1x32x8xf32>
    %89 = vector.shape_cast %88 : vector<1x32x8xf32> to vector<32x8xf32>
    %cst_65 = arith.constant dense<0.000000e+00> : vector<16x8xf32>
    %90 = tpu.matmul %0, %89, %cst_65 {dimension_numbers = #tpu.dot_dimension_numbers<[1], [0], [0], [1], [0, 0, 1, 1], [], []>} : vector<16x32xf32>, vector<32x8xf32>, vector<16x8xf32> -> vector<16x8xf32>
    %c2_66 = arith.constant 2 : index
    %c0_67 = arith.constant 0 : index
    %c0_68 = arith.constant 0 : index
    %91 = vector.load %arg6[%c2_66, %c0_67, %c0_68] : memref<4x1x8xf32, #tpu.memory_space<vmem>>, vector<1x1x8xf32>
    %92 = vector.shape_cast %91 : vector<1x1x8xf32> to vector<1x8xf32>
    %93 = vector.broadcast %92 : vector<1x8xf32> to vector<16x8xf32>
    %94 = arith.addf %90, %93 : vector<16x8xf32>
    %c2_69 = arith.constant 2 : index
    %c0_70 = arith.constant 0 : index
    %c0_71 = arith.constant 0 : index
    %95 = vector.load %arg4[%c2_69, %c0_70, %c0_71] : memref<4x32x8xf32, #tpu.memory_space<vmem>>, vector<1x32x8xf32>
    %96 = vector.shape_cast %95 : vector<1x32x8xf32> to vector<32x8xf32>
    %cst_72 = arith.constant dense<0.000000e+00> : vector<16x8xf32>
    %97 = tpu.matmul %1, %96, %cst_72 {dimension_numbers = #tpu.dot_dimension_numbers<[1], [0], [0], [1], [0, 0, 1, 1], [], []>} : vector<16x32xf32>, vector<32x8xf32>, vector<16x8xf32> -> vector<16x8xf32>
    %c2_73 = arith.constant 2 : index
    %c0_74 = arith.constant 0 : index
    %c0_75 = arith.constant 0 : index
    %98 = vector.load %arg7[%c2_73, %c0_74, %c0_75] : memref<4x1x8xf32, #tpu.memory_space<vmem>>, vector<1x1x8xf32>
    %99 = vector.shape_cast %98 : vector<1x1x8xf32> to vector<1x8xf32>
    %100 = vector.broadcast %99 : vector<1x8xf32> to vector<16x8xf32>
    %101 = arith.addf %97, %100 : vector<16x8xf32>
    %c2_76 = arith.constant 2 : index
    %c0_77 = arith.constant 0 : index
    %c0_78 = arith.constant 0 : index
    %102 = vector.load %arg5[%c2_76, %c0_77, %c0_78] : memref<4x32x8xf32, #tpu.memory_space<vmem>>, vector<1x32x8xf32>
    %103 = vector.shape_cast %102 : vector<1x32x8xf32> to vector<32x8xf32>
    %cst_79 = arith.constant dense<0.000000e+00> : vector<16x8xf32>
    %104 = tpu.matmul %2, %103, %cst_79 {dimension_numbers = #tpu.dot_dimension_numbers<[1], [0], [0], [1], [0, 0, 1, 1], [], []>} : vector<16x32xf32>, vector<32x8xf32>, vector<16x8xf32> -> vector<16x8xf32>
    %c2_80 = arith.constant 2 : index
    %c0_81 = arith.constant 0 : index
    %c0_82 = arith.constant 0 : index
    %105 = vector.load %arg8[%c2_80, %c0_81, %c0_82] : memref<4x1x8xf32, #tpu.memory_space<vmem>>, vector<1x1x8xf32>
    %106 = vector.shape_cast %105 : vector<1x1x8xf32> to vector<1x8xf32>
    %107 = vector.broadcast %106 : vector<1x8xf32> to vector<16x8xf32>
    %108 = arith.addf %104, %107 : vector<16x8xf32>
    %109 = vector.shape_cast %94 : vector<16x8xf32> to vector<2x8x8xf32>
    %110 = vector.shape_cast %101 : vector<16x8xf32> to vector<2x8x8xf32>
    %111 = vector.shape_cast %108 : vector<16x8xf32> to vector<2x8x8xf32>
    "tpu.trace_start"() <{level = 10 : i32, message = "bqd,bkd->bqk"}> : () -> ()
    %cst_83 = arith.constant dense<0.000000e+00> : vector<2x8x8xf32>
    %112 = tpu.matmul %109, %110, %cst_83 {dimension_numbers = #tpu.dot_dimension_numbers<[2], [2], [1], [1], [0, 0, 0, 1, 1, 1], [0], [0]>} : vector<2x8x8xf32>, vector<2x8x8xf32>, vector<2x8x8xf32> -> vector<2x8x8xf32>
    "tpu.trace_stop"() : () -> ()
    %cst_84 = arith.constant dense<0xFF800000> : vector<2x8xf32>
    %113 = vector.multi_reduction <maximumf>, %112, %cst_84 [2] : vector<2x8x8xf32> to vector<2x8xf32>
    %114 = vector.shape_cast %113 : vector<2x8xf32> to vector<2x8x1xf32>
    %115 = vector.broadcast %114 : vector<2x8x1xf32> to vector<2x8x8xf32>
    %116 = arith.subf %112, %115 : vector<2x8x8xf32>
    %117 = math.exp %116 : vector<2x8x8xf32>
    %cst_85 = arith.constant dense<0.000000e+00> : vector<2x8xf32>
    %118 = vector.multi_reduction <add>, %117, %cst_85 [2] : vector<2x8x8xf32> to vector<2x8xf32>
    %119 = vector.shape_cast %118 : vector<2x8xf32> to vector<2x8x1xf32>
    %120 = tpu.reciprocal %119 : vector<2x8x1xf32> -> vector<2x8x1xf32>
    %121 = vector.broadcast %120 : vector<2x8x1xf32> to vector<2x8x8xf32>
    %122 = arith.mulf %117, %121 : vector<2x8x8xf32>
    "tpu.trace_start"() <{level = 10 : i32, message = "bqk,bkd->bqd"}> : () -> ()
    %cst_86 = arith.constant dense<0.000000e+00> : vector<2x8x8xf32>
    %123 = tpu.matmul %122, %111, %cst_86 {dimension_numbers = #tpu.dot_dimension_numbers<[2], [1], [1], [2], [0, 0, 0, 1, 1, 2], [0], [0]>} : vector<2x8x8xf32>, vector<2x8x8xf32>, vector<2x8x8xf32> -> vector<2x8x8xf32>
    "tpu.trace_stop"() : () -> ()
    %124 = vector.shape_cast %123 : vector<2x8x8xf32> to vector<16x8xf32>
    %c2_87 = arith.constant 2 : index
    %c0_88 = arith.constant 0 : index
    %c0_89 = arith.constant 0 : index
    %125 = vector.load %arg9[%c2_87, %c0_88, %c0_89] : memref<4x8x32xf32, #tpu.memory_space<vmem>>, vector<1x8x32xf32>
    %126 = vector.shape_cast %125 : vector<1x8x32xf32> to vector<8x32xf32>
    %cst_90 = arith.constant dense<0.000000e+00> : vector<16x32xf32>
    %127 = tpu.matmul %124, %126, %cst_90 {dimension_numbers = #tpu.dot_dimension_numbers<[1], [0], [0], [1], [0, 0, 1, 1], [], []>} : vector<16x8xf32>, vector<8x32xf32>, vector<16x32xf32> -> vector<16x32xf32>
    %128 = arith.addf %87, %127 : vector<16x32xf32>
    %c3 = arith.constant 3 : index
    %c0_91 = arith.constant 0 : index
    %c0_92 = arith.constant 0 : index
    %129 = vector.load %arg3[%c3, %c0_91, %c0_92] : memref<4x32x8xf32, #tpu.memory_space<vmem>>, vector<1x32x8xf32>
    %130 = vector.shape_cast %129 : vector<1x32x8xf32> to vector<32x8xf32>
    %cst_93 = arith.constant dense<0.000000e+00> : vector<16x8xf32>
    %131 = tpu.matmul %0, %130, %cst_93 {dimension_numbers = #tpu.dot_dimension_numbers<[1], [0], [0], [1], [0, 0, 1, 1], [], []>} : vector<16x32xf32>, vector<32x8xf32>, vector<16x8xf32> -> vector<16x8xf32>
    %c3_94 = arith.constant 3 : index
    %c0_95 = arith.constant 0 : index
    %c0_96 = arith.constant 0 : index
    %132 = vector.load %arg6[%c3_94, %c0_95, %c0_96] : memref<4x1x8xf32, #tpu.memory_space<vmem>>, vector<1x1x8xf32>
    %133 = vector.shape_cast %132 : vector<1x1x8xf32> to vector<1x8xf32>
    %134 = vector.broadcast %133 : vector<1x8xf32> to vector<16x8xf32>
    %135 = arith.addf %131, %134 : vector<16x8xf32>
    %c3_97 = arith.constant 3 : index
    %c0_98 = arith.constant 0 : index
    %c0_99 = arith.constant 0 : index
    %136 = vector.load %arg4[%c3_97, %c0_98, %c0_99] : memref<4x32x8xf32, #tpu.memory_space<vmem>>, vector<1x32x8xf32>
    %137 = vector.shape_cast %136 : vector<1x32x8xf32> to vector<32x8xf32>
    %cst_100 = arith.constant dense<0.000000e+00> : vector<16x8xf32>
    %138 = tpu.matmul %1, %137, %cst_100 {dimension_numbers = #tpu.dot_dimension_numbers<[1], [0], [0], [1], [0, 0, 1, 1], [], []>} : vector<16x32xf32>, vector<32x8xf32>, vector<16x8xf32> -> vector<16x8xf32>
    %c3_101 = arith.constant 3 : index
    %c0_102 = arith.constant 0 : index
    %c0_103 = arith.constant 0 : index
    %139 = vector.load %arg7[%c3_101, %c0_102, %c0_103] : memref<4x1x8xf32, #tpu.memory_space<vmem>>, vector<1x1x8xf32>
    %140 = vector.shape_cast %139 : vector<1x1x8xf32> to vector<1x8xf32>
    %141 = vector.broadcast %140 : vector<1x8xf32> to vector<16x8xf32>
    %142 = arith.addf %138, %141 : vector<16x8xf32>
    %c3_104 = arith.constant 3 : index
    %c0_105 = arith.constant 0 : index
    %c0_106 = arith.constant 0 : index
    %143 = vector.load %arg5[%c3_104, %c0_105, %c0_106] : memref<4x32x8xf32, #tpu.memory_space<vmem>>, vector<1x32x8xf32>
    %144 = vector.shape_cast %143 : vector<1x32x8xf32> to vector<32x8xf32>
    %cst_107 = arith.constant dense<0.000000e+00> : vector<16x8xf32>
    %145 = tpu.matmul %2, %144, %cst_107 {dimension_numbers = #tpu.dot_dimension_numbers<[1], [0], [0], [1], [0, 0, 1, 1], [], []>} : vector<16x32xf32>, vector<32x8xf32>, vector<16x8xf32> -> vector<16x8xf32>
    %c3_108 = arith.constant 3 : index
    %c0_109 = arith.constant 0 : index
    %c0_110 = arith.constant 0 : index
    %146 = vector.load %arg8[%c3_108, %c0_109, %c0_110] : memref<4x1x8xf32, #tpu.memory_space<vmem>>, vector<1x1x8xf32>
    %147 = vector.shape_cast %146 : vector<1x1x8xf32> to vector<1x8xf32>
    %148 = vector.broadcast %147 : vector<1x8xf32> to vector<16x8xf32>
    %149 = arith.addf %145, %148 : vector<16x8xf32>
    %150 = vector.shape_cast %135 : vector<16x8xf32> to vector<2x8x8xf32>
    %151 = vector.shape_cast %142 : vector<16x8xf32> to vector<2x8x8xf32>
    %152 = vector.shape_cast %149 : vector<16x8xf32> to vector<2x8x8xf32>
    "tpu.trace_start"() <{level = 10 : i32, message = "bqd,bkd->bqk"}> : () -> ()
    %cst_111 = arith.constant dense<0.000000e+00> : vector<2x8x8xf32>
    %153 = tpu.matmul %150, %151, %cst_111 {dimension_numbers = #tpu.dot_dimension_numbers<[2], [2], [1], [1], [0, 0, 0, 1, 1, 1], [0], [0]>} : vector<2x8x8xf32>, vector<2x8x8xf32>, vector<2x8x8xf32> -> vector<2x8x8xf32>
    "tpu.trace_stop"() : () -> ()
    %cst_112 = arith.constant dense<0xFF800000> : vector<2x8xf32>
    %154 = vector.multi_reduction <maximumf>, %153, %cst_112 [2] : vector<2x8x8xf32> to vector<2x8xf32>
    %155 = vector.shape_cast %154 : vector<2x8xf32> to vector<2x8x1xf32>
    %156 = vector.broadcast %155 : vector<2x8x1xf32> to vector<2x8x8xf32>
    %157 = arith.subf %153, %156 : vector<2x8x8xf32>
    %158 = math.exp %157 : vector<2x8x8xf32>
    %cst_113 = arith.constant dense<0.000000e+00> : vector<2x8xf32>
    %159 = vector.multi_reduction <add>, %158, %cst_113 [2] : vector<2x8x8xf32> to vector<2x8xf32>
    %160 = vector.shape_cast %159 : vector<2x8xf32> to vector<2x8x1xf32>
    %161 = tpu.reciprocal %160 : vector<2x8x1xf32> -> vector<2x8x1xf32>
    %162 = vector.broadcast %161 : vector<2x8x1xf32> to vector<2x8x8xf32>
    %163 = arith.mulf %158, %162 : vector<2x8x8xf32>
    "tpu.trace_start"() <{level = 10 : i32, message = "bqk,bkd->bqd"}> : () -> ()
    %cst_114 = arith.constant dense<0.000000e+00> : vector<2x8x8xf32>
    %164 = tpu.matmul %163, %152, %cst_114 {dimension_numbers = #tpu.dot_dimension_numbers<[2], [1], [1], [2], [0, 0, 0, 1, 1, 2], [0], [0]>} : vector<2x8x8xf32>, vector<2x8x8xf32>, vector<2x8x8xf32> -> vector<2x8x8xf32>
    "tpu.trace_stop"() : () -> ()
    %165 = vector.shape_cast %164 : vector<2x8x8xf32> to vector<16x8xf32>
    %c3_115 = arith.constant 3 : index
    %c0_116 = arith.constant 0 : index
    %c0_117 = arith.constant 0 : index
    %166 = vector.load %arg9[%c3_115, %c0_116, %c0_117] : memref<4x8x32xf32, #tpu.memory_space<vmem>>, vector<1x8x32xf32>
    %167 = vector.shape_cast %166 : vector<1x8x32xf32> to vector<8x32xf32>
    %cst_118 = arith.constant dense<0.000000e+00> : vector<16x32xf32>
    %168 = tpu.matmul %165, %167, %cst_118 {dimension_numbers = #tpu.dot_dimension_numbers<[1], [0], [0], [1], [0, 0, 1, 1], [], []>} : vector<16x8xf32>, vector<8x32xf32>, vector<16x32xf32> -> vector<16x32xf32>
    %169 = arith.addf %128, %168 : vector<16x32xf32>
    %c0_119 = arith.constant 0 : index
    %c0_120 = arith.constant 0 : index
    %170 = vector.load %arg11[%c0_119, %c0_120] : memref<16x32xf32, #tpu.memory_space<vmem>>, vector<16x32xf32>
    tpu.vector_store %arg11[%c0_119, %c0_120], %169 {strides = array<i32>} : memref<16x32xf32, #tpu.memory_space<vmem>>, vector<16x32xf32>,
    return
  }
}

</mosaic_0001>

<bundles_post_ra>
// kernel: tpu_custom_call.1
= control target key start
LH: loop header
LB: loop body
LE: loop exit
PB: predicated region body
PF: predicated region fallthrough
CT: control target
= control target key end

     0   :  { %vm63_vm0 = vcmask 261120   ;;  %s3837_s0 = inlined_call_operand.vmem [shape: f32[16,32], index: 0, kind: input, shape index: {}]   ;;  %s3838_s1 = inlined_call_operand.vmem [shape: f32[16,32], index: 1, kind: input, shape index: {}]   ;;  %s3839_s2 = inlined_call_operand.vmem [shape: f32[16,32], index: 2, kind: input, shape index: {}]   ;;  %s3840_s3 = inlined_call_operand.vmem [shape: f32[4,32,8], index: 3, kind: input, shape index: {}]   ;;  %s3841_s4 = inlined_call_operand.vmem [shape: f32[4,32,8], index: 4, kind: input, shape index: {}]   ;;  %s3842_s5 = inlined_call_operand.vmem [shape: f32[4,32,8], index: 5, kind: input, shape index: {}]   ;;  %s3843_s6 = inlined_call_operand.vmem [shape: f32[4,1,8], index: 6, kind: input, shape index: {}]   ;;  %s3844_s7 = inlined_call_operand.vmem [shape: f32[4,1,8], index: 7, kind: input, shape index: {}]   ;;  %s3845_s8 = inlined_call_operand.vmem [shape: f32[4,1,8], index: 8, kind: input, shape index: {}]   ;;  %s3846_s9 = inlined_call_operand.vmem [shape: f32[4,8,32], index: 9, kind: input, shape index: {}]   ;;  %s3847_s10 = inlined_call_operand.vmem [shape: f32[1,32], index: 10, kind: input, shape index: {}]   ;;  %s3848_s11 = inlined_call_operand.hbm [shape: f32[16,32], index: 11, kind: output, shape index: {}]  }
   0x1   :  { %v145_v0 = vld [vmem:[%s3841_s4] sm:$0xff]  ;;  %v146_v1 = vld [vmem:[%s3841_s4 + $0x8] sm:$0xff]  ;;  %v147_v5 = vld [vmem:[%s3841_s4 + $0x10] sm:$0xff] }
   0x2   :  { %v52_v2 = vld [vmem:[%s3840_s3] sm:$0xff]  ;;  %v3232_v3 = vpack.c.bf16 %v146_v1, %v145_v0  ;;  %v53_v4 = vld [vmem:[%s3840_s3 + $0x8] sm:$0xff]  ;;  %v148_v6 = vld [vmem:[%s3841_s4 + $0x18] sm:$0xff] }
   0x3   :  { %v3224_v7 = vpack.c.bf16 %v53_v4, %v52_v2  ;;  %v3236_v8 = vpack.c.bf16 %v148_v6, %v147_v5  ;;  %v54_v9 = vld [vmem:[%s3840_s3 + $0x10] sm:$0xff]  ;;  %v55_v10 = vld [vmem:[%s3840_s3 + $0x18] sm:$0xff]  ;;  %v3481_v11 = vld [vmem:[%s3838_s1] sm:$0xff] }
   0x4   :  { %3233 = vmatprep.subr.bf16.mxu1 %v3232_v3  ;;  %v3228_v12 = vpack.c.bf16 %v55_v10, %v54_v9  ;;  %3011 = vmatprep.mubr.msk.f32.mxu1 %vm63_vm0, %v3481_v11  ;;  %v3488_v13 = vld [vmem:[%s3837_s0] sm:$0xff] }
   0x5   :  { %3235 = vmatpush3.bf16.msra.mxu1 %v3232_v3  ;;  %3225 = vmatprep.subr.bf16.mxu0 %v3224_v7 }
   0x6   :  { %16 = vsyncpa [#allocation3], 0  ;;  %3227 = vmatpush3.bf16.msra.mxu0 %v3224_v7  ;;  %3237 = vmatprep.subr.bf16.mxu1 %v3236_v8  ;;  %v3495_v14 = vld [vmem:[%s3838_s1 + $0x8] sm:$0xff]  ;;  %v3389_v16 = vmov 0.0   ;;  %vm3390_vm1 = vmmov 0   ;;  %vm329_vm2 = vcmask 64512  }
   0x7   :  { %3229 = vmatprep.subr.bf16.mxu0 %v3228_v12  ;;  %3000 = vmatprep.mubr.msk.f32.mxu0 %vm63_vm0, %v3488_v13  ;;  %v3500_v15 = vld [vmem:[%s3837_s0 + $0x8] sm:$0xff]  ;;  %v2763_v17 = vld [vmem:[%s3844_s7] ss:$0 sm:$0xff]  ;;  %v239_v29 = vld [vmem:[%s3842_s5 + $0x10] sm:$0xff]  ;;  %s3391_s0 = smov [#allocation2]  }
   0x8   :  { %v2760_v19 = vld [vmem:[%s3843_s6] ss:$0 sm:$0xff]  ;;  %v238_v28 = vld [vmem:[%s3842_s5 + $0x8] sm:$0xff]  ;;  %v240_v31 = vld [vmem:[%s3842_s5 + $0x18] sm:$0xff]  ;;  %s2748_s23 = sshll.u32 %s3391_s0, 4  ;;  %s2749_s23 = int_to_ptr.vmem [resolvable:$true] %s2748_s23 }
   0x9   :  { %3239 = vmatpush3.bf16.msra.mxu1 %v3236_v8  ;;  %v237_v27 = vld [vmem:[%s3842_s5] sm:$0xff]  ;;  %v3244_v33 = vpack.c.bf16 %v240_v31, %v239_v29  ;;  %v3547_v34 = vld [vmem:[%s3839_s2 + $0x8] sm:$0xff]  ;;  %v2779_v5 = vld [vmem:[%s3840_s3 + $0x30] sm:$0xff]  ;;  %p3370_p1 = scmp.lt.s32.totalorder %s2749_s23, %s2749_s23 }
   0xa   :  { %3231 = vmatpush3.bf16.msra.mxu0 %v3228_v12  ;;  %3025 = vmatprep.subr.mxu1 %v3389_v16  ;;  %v3240_v30 = vpack.c.bf16 %v238_v28, %v237_v27  ;;  %v3540_v32 = vld [vmem:[%s3839_s2] sm:$0xff]  ;;  %v2786_v0 = vld [vmem:[%s3841_s4 + $0x28] sm:$0xff]  ;;  %v2780_v6 = vld [vmem:[%s3840_s3 + $0x38] sm:$0xff] }
   0xb   :  { %v2766_v52 = vld [vmem:[%s3845_s8] ss:$0 sm:$0xff]  ;;  %v2778_v3 = vld [vmem:[%s3840_s3 + $0x28] sm:$0xff]  ;;  %v3252_v7 = vpack.c.bf16 %v2780_v6, %v2779_v5  ;;  %v2787_v9 = vld [vmem:[%s3841_s4 + $0x30] sm:$0xff] }
   0xc   :  { %3012 = vmatmul.mubr.msk.f32.vlgmr.msra.gmra.mrb[0].mxu1 %vm63_vm0, %v3495_v14  ;;  %3241 = vmatprep.subr.bf16.mxu0 %v3240_v30  ;;  %v650_v62 = vld [vmem:[%s3846_s9] sm:$0xff]  ;;  %v2788_v10 = vld [vmem:[%s3841_s4 + $0x38] sm:$0xff]  ;;  %v2794_v31 = vld [vmem:[%s3842_s5 + $0x28] sm:$0xff] }
   0xd   :  { %3001 = vmatmul.mubr.msk.f32.vlgmr.msra.gmra.mrb[0].mxu0 %vm63_vm0, %v3500_v15  ;;  %3027 = vmatprep.mubr.msk.f32.mxu1 %vm3390_vm1, %v3389_v16  ;;  %v2785_v63 = vld [vmem:[%s3841_s4 + $0x20] sm:$0xff]  ;;  %v2811_v6 = vld [vmem:[%s3840_s3 + $0x48] sm:$0xff] }
   0xe   :  { %3022 = vmatprep.mubr.msk.f32.mxu0 %vm63_vm0, %v3540_v32  ;;  %3243 = vmatpush3.bf16.msra.mxu0 %v3240_v30  ;;  %v3256_v1 = vpack.c.bf16 %v2786_v0, %v2785_v63  ;;  %v2777_v2 = vld [vmem:[%s3840_s3 + $0x20] sm:$0xff] }
   0xf   :  { %3245 = vmatprep.subr.bf16.mxu0 %v3244_v33  ;;  %v3248_v4 = vpack.c.bf16 %v2778_v3, %v2777_v2  ;;  %v2793_v30 = vld [vmem:[%s3842_s5 + $0x20] sm:$0xff]  ;;  %v2819_v3 = vld [vmem:[%s3841_s4 + $0x48] sm:$0xff] }
  0x10   :  { %v2818_v2 = vld [vmem:[%s3841_s4 + $0x40] sm:$0xff] }
  0x11   :  { %v2810_v5 = vld [vmem:[%s3840_s3 + $0x40] sm:$0xff] }
  0x12   :  { %3247 = vmatpush3.bf16.msra.mxu0 %v3244_v33  ;;  %v2795_v33 = vld [vmem:[%s3842_s5 + $0x30] sm:$0xff] }
  0x13   :  { %3045 = vmatprep.subr.mxu0 %v650_v62 }
  0x15   :  { %3023 = vmatmul.mubr.msk.f32.vlgmr.msra.gmra.mrb[2].mxu0 %vm63_vm0, %v3547_v34 }
  0x16   :  { %3046 = vmatpush3.msra.mxu0 %v650_v62 }
  0x17   :  { %3257 = vmatprep.subr.bf16.mxu0 %v3256_v1 }
  0xdf   :  { %v3013_v18 = vpop.f32.mrb[0].mxu1 }
  0xe0   :  { %v228_v20 = vpop.f32.mrb[1].mxu1  ;;  %v3002_v21 = vpop.f32.mrb[0].mxu0  ;;  %v234_v25 = vadd.f32 %v3013_v18, %v2763_v17 }
  0xe1   :  { %v229_v22 = vadd.f32 %v2763_v17, %v228_v20  ;;  %v136_v23 = vpop.f32.mrb[1].mxu0  ;;  %v142_v26 = vadd.f32 %v3002_v21, %v2760_v19  ;;  %v3260_v17 = vpack.c.bf16 %v2788_v10, %v2787_v9  ;;  %v2813_v9 = vld [vmem:[%s3840_s3 + $0x58] sm:$0xff] }
  0xe2   :  { %v137_v24 = vadd.f32 %v2760_v19, %v136_v23 }
  0xe3   :  { %3026 = vmatpush3.xpose.msk.msra.mxu1 %vm329_vm2, %v229_v22  ;;  %v2790_v22 = vld [vmem:[%s3844_s7 + $0x1] ss:$0 sm:$0xff] }
  0xe4   :  { %3030 = vmatprep.subr.mxu1 %v3389_v16 }
  0xe6   :  { %3028 = vmatmul.mubr.msk.f32.vlgmr.msra.gmra.mrb[2].mxu1 %vm329_vm2, %v137_v24  ;;  %v2782_v24 = vld [vmem:[%s3843_s6 + $0x1] ss:$0 sm:$0xff] }
  0xe7   :  { %3031 = vmatpush3.xpose.msk.msra.mxu1 %vm329_vm2, %v234_v25  ;;  %3032 = vmatprep.mubr.msk.f32.mxu1 %vm3390_vm1, %v3389_v16 }
  0xe8   :  { %3035 = vmatprep.subr.mxu1 %v3389_v16  ;;  %v3024_v51 = vpop.f32.mrb[2].mxu0 }
  0xe9   :  { %v320_v53 = vpop.f32.mrb[3].mxu0  ;;  %v326_v54 = vadd.f32 %v3024_v51, %v2766_v52 }
  0xea   :  { %3033 = vmatmul.mubr.msk.f32.vlgmr.msra.gmra.mrb[4].mxu1 %vm329_vm2, %v142_v26  ;;  %v321_v55 = vadd.f32 %v2766_v52, %v320_v53 }
  0xeb   :  { %3037 = vmatprep.mubr.msk.f32.mxu1 %vm3390_vm1, %v3389_v16 }
  0xec   :  { %3036 = vmatpush3.msra.mxu1 %v321_v55  ;;  %v2798_v55 = vld [vmem:[%s3845_s8 + $0x1] ss:$0 sm:$0xff] }
  0xed   :  { %3040 = vmatprep.subr.mxu1 %v3389_v16 }
 0x1b9   :  { %v402_v35 = vpop.f32.mrb[2].mxu1 }
 0x1ba   :  { %v3029_v36 = vpop.f32.mrb[3].mxu1  ;;  %v482_v37 = vsel %vm329_vm2, %v402_v35, -inf }
 0x1bb   :  { %483 = vmax.xlane.f32.xlu0 %v482_v37  ;;  %v2796_v36 = vld [vmem:[%s3842_s5 + $0x38] sm:$0xff] }
 0x1bc   :  { %v3268_v37 = vpack.c.bf16 %v2796_v36, %v2795_v33  ;;  %v2815_v36 = vld [vmem:[%s3843_s6 + $0x2] ss:$0 sm:$0xff] }
 0x1bd   :  { %v478_v38 = vpop.f32.mrb[4].mxu1 }
 0x1be   :  { %v3034_v39 = vpop.f32.mrb[5].mxu1  ;;  %v485_v40 = vsel %vm329_vm2, %v478_v38, -inf }
 0x1bf   :  { %486 = vmax.xlane.f32.xlu0 %v485_v40 }
 0x248   :  { %v484_v41 = vpop.xlane.xlu0 %483 }
 0x249   :  { %v488_v42 = vsub.f32 %v402_v35, %v484_v41  ;;  %v3264_v35 = vpack.c.bf16 %v2794_v31, %v2793_v30 }
 0x24b   :  { %v490_v43 = vmul.f32 1.442695, %v488_v42 }
 0x24c   :  { %v487_v44 = vpop.xlane.xlu0 %486 }
 0x24d   :  { %3333 = vpow2.f32 %v490_v43  ;;  %v489_v45 = vsub.f32 %v478_v38, %v487_v44 }
 0x24f   :  { %v492_v46 = vmul.f32 1.442695, %v489_v45 }
 0x251   :  { %3335 = vpow2.f32 %v492_v46 }
 0x257   :  { %v3334_v47 = vpop.eup %3333 }
 0x258   :  { %v494_v48 = vsel %vm329_vm2, %v3334_v47, 0.0 }
 0x259   :  { %495 = vadd.xlane.f32.xlu1 %v494_v48 }
 0x25b   :  { %v3336_v49 = vpop.eup %3335 }
 0x25c   :  { %v497_v50 = vsel %vm329_vm2, %v3336_v49, 0.0 }
 0x25d   :  { %498 = vadd.xlane.f32.xlu1 %v497_v50 }
 0x2e6   :  { %v496_v56 = vpop.xlane.xlu1 %495 }
 0x2e7   :  { %3337 = vrcp.f32 %v496_v56 }
 0x2ea   :  { %v499_v57 = vpop.xlane.xlu1 %498 }
 0x2eb   :  { %3339 = vrcp.f32 %v499_v57 }
 0x2f1   :  { %v3338_v58 = vpop.eup %3337 }
 0x2f2   :  { %v502_v59 = vmul.f32 %v3338_v58, %v3334_v47 }
 0x2f4   :  { %3038 = vmatmul.mubr.msk.f32.vlgmr.msra.gmra.mrb[6].mxu1 %vm329_vm2, %v502_v59 }
 0x2f5   :  { %v3340_v60 = vpop.eup %3339  ;;  %3041 = vmatpush3.msra.mxu1 %v326_v54  ;;  %3042 = vmatprep.mubr.msk.f32.mxu1 %vm3390_vm1, %v3389_v16 }
 0x2f6   :  { %v503_v61 = vmul.f32 %v3340_v60, %v3336_v49  ;;  %3249 = vmatprep.subr.bf16.mxu1 %v3248_v4 }
 0x2f8   :  { %3043 = vmatmul.mubr.msk.f32.vlgmr.msra.gmra.mrb[8].mxu1 %vm329_vm2, %v503_v61 }
 0x2f9   :  { %3058 = vmatprep.mubr.msk.f32.mxu1 %vm63_vm0, %v3488_v13  ;;  %3251 = vmatpush3.bf16.msra.mxu1 %v3248_v4  ;;  %v3280_v4 = vpack.c.bf16 %v2819_v3, %v2818_v2 }
 0x2fa   :  { %3253 = vmatprep.subr.bf16.mxu1 %v3252_v7 }
 0x2fd   :  { %3255 = vmatpush3.bf16.msra.mxu1 %v3252_v7  ;;  %v3272_v7 = vpack.c.bf16 %v2811_v6, %v2810_v5  ;;  %v2851_v5 = vld [vmem:[%s3841_s4 + $0x60] sm:$0xff]  ;;  %v2852_v6 = vld [vmem:[%s3841_s4 + $0x68] sm:$0xff] }
 0x2fe   :  { %3265 = vmatprep.subr.bf16.mxu1 %v3264_v35 }
 0x300   :  { %3059 = vmatmul.mubr.msk.f32.vlgmr.msra.gmra.mrb[10].mxu1 %vm63_vm0, %v3500_v15 }
 0x301   :  { %3080 = vmatprep.mubr.msk.f32.mxu1 %vm63_vm0, %v3540_v32  ;;  %3267 = vmatpush3.bf16.msra.mxu1 %v3264_v35  ;;  %v2823_v35 = vld [vmem:[%s3844_s7 + $0x2] ss:$0 sm:$0xff] }
 0x302   :  { %3269 = vmatprep.subr.bf16.mxu1 %v3268_v37 }
 0x305   :  { %3271 = vmatpush3.bf16.msra.mxu1 %v3268_v37 }
 0x306   :  { %3093 = vmatprep.subr.mxu1 %v3389_v16 }
 0x308   :  { %3081 = vmatmul.mubr.msk.f32.vlgmr.msra.gmra.mrb[12].mxu1 %vm63_vm0, %v3547_v34 }
 0x309   :  { %3095 = vmatprep.mubr.msk.f32.mxu1 %vm3390_vm1, %v3389_v16 }
 0x3c7   :  { %v573_v8 = vpop.f32.mrb[6].mxu1 }
 0x3c8   :  { %v3039_v12 = vpop.f32.mrb[7].mxu1  ;;  %3047 = vmatprep.mubr.msk.f32.mxu0 %vm329_vm2, %v573_v8  ;;  %v2812_v8 = vld [vmem:[%s3840_s3 + $0x50] sm:$0xff] }
 0x3c9   :  { %v3276_v10 = vpack.c.bf16 %v2813_v9, %v2812_v8  ;;  %v2826_v12 = vld [vmem:[%s3842_s5 + $0x40] sm:$0xff]  ;;  %v2844_v9 = vld [vmem:[%s3840_s3 + $0x68] sm:$0xff] }
 0x3ca   :  { %v2843_v8 = vld [vmem:[%s3840_s3 + $0x60] sm:$0xff] }
 0x3cb   :  { %v646_v18 = vpop.f32.mrb[8].mxu1 }
 0x3cc   :  { %v3044_v19 = vpop.f32.mrb[9].mxu1  ;;  %3048 = vmatmul.mubr.msk.f32.vlgmr.msra.gmra.mrb[4].mxu0 %vm329_vm2, %v646_v18  ;;  %v2828_v18 = vld [vmem:[%s3842_s5 + $0x50] sm:$0xff] }
 0x3cd   :  { %3259 = vmatpush3.bf16.msra.mxu0 %v3256_v1  ;;  %3069 = vmatprep.mubr.msk.f32.mxu0 %vm63_vm0, %v3481_v11  ;;  %v2807_v1 = vld [vmem:[%s3846_s9 + $0x8] sm:$0xff] }
 0x3ce   :  { %3261 = vmatprep.subr.bf16.mxu0 %v3260_v17 }
 0x3d1   :  { %3263 = vmatpush3.bf16.msra.mxu0 %v3260_v17  ;;  %v2827_v17 = vld [vmem:[%s3842_s5 + $0x48] sm:$0xff] }
 0x3d2   :  { %3083 = vmatprep.subr.mxu0 %v3389_v16  ;;  %v3288_v19 = vpack.c.bf16 %v2827_v17, %v2826_v12  ;;  %v2846_v12 = vld [vmem:[%s3840_s3 + $0x78] sm:$0xff] }
 0x3d3   :  { %v3060_v20 = vpop.f32.mrb[10].mxu1 }
 0x3d4   :  { %3070 = vmatmul.mubr.msk.f32.vlgmr.msra.gmra.mrb[6].mxu0 %vm63_vm0, %v3495_v14  ;;  %v813_v21 = vpop.f32.mrb[11].mxu1  ;;  %v819_v29 = vadd.f32 %v3060_v20, %v2782_v24  ;;  %v2829_v20 = vld [vmem:[%s3842_s5 + $0x58] sm:$0xff] }
 0x3d5   :  { %3085 = vmatprep.mubr.msk.f32.mxu0 %vm3390_vm1, %v3389_v16  ;;  %v814_v27 = vadd.f32 %v2782_v24, %v813_v21  ;;  %v3292_v21 = vpack.c.bf16 %v2829_v20, %v2828_v18  ;;  %v2821_v24 = vld [vmem:[%s3841_s4 + $0x58] sm:$0xff]  ;;  %v2853_v18 = vld [vmem:[%s3841_s4 + $0x70] sm:$0xff] }
 0x3db   :  { %v3082_v54 = vpop.f32.mrb[12].mxu1 }
 0x3dc   :  { %v989_v56 = vpop.f32.mrb[13].mxu1  ;;  %v995_v58 = vadd.f32 %v3082_v54, %v2798_v55 }
 0x3dd   :  { %v990_v57 = vadd.f32 %v2798_v55, %v989_v56 }
 0x3df   :  { %3094 = vmatpush3.msra.mxu1 %v990_v57 }
 0x3e0   :  { %3273 = vmatprep.subr.bf16.mxu1 %v3272_v7 }
 0x4a7   :  { %v3071_v23 = vpop.f32.mrb[6].mxu0 }
 0x4a8   :  { %v901_v25 = vpop.f32.mrb[7].mxu0  ;;  %v907_v28 = vadd.f32 %v3071_v23, %v2790_v22  ;;  %v2820_v23 = vld [vmem:[%s3841_s4 + $0x50] sm:$0xff] }
 0x4a9   :  { %v902_v26 = vadd.f32 %v2790_v22, %v901_v25 }
 0x4ab   :  { %3084 = vmatpush3.xpose.msk.msra.mxu0 %vm329_vm2, %v902_v26  ;;  %v3284_v26 = vpack.c.bf16 %v2821_v24, %v2820_v23 }
 0x4ac   :  { %3088 = vmatprep.subr.mxu0 %v3389_v16 }
 0x4ae   :  { %3086 = vmatmul.mubr.msk.f32.vlgmr.msra.gmra.mrb[8].mxu0 %vm329_vm2, %v814_v27 }
 0x4af   :  { %3089 = vmatpush3.xpose.msk.msra.mxu0 %vm329_vm2, %v907_v28  ;;  %3090 = vmatprep.mubr.msk.f32.mxu0 %vm3390_vm1, %v3389_v16 }
 0x4b0   :  { %3098 = vmatprep.subr.mxu0 %v3389_v16 }
 0x4b2   :  { %3091 = vmatmul.mubr.msk.f32.vlgmr.msra.gmra.mrb[10].mxu0 %vm329_vm2, %v819_v29 }
 0x4b3   :  { %3100 = vmatprep.mubr.msk.f32.mxu0 %vm3390_vm1, %v3389_v16  ;;  %3099 = vmatpush3.msra.mxu0 %v995_v58 }
 0x4b4   :  { %3103 = vmatprep.subr.mxu0 %v2807_v1 }
 0x581   :  { %v1070_v38 = vpop.f32.mrb[8].mxu0 }
 0x582   :  { %v3087_v39 = vpop.f32.mrb[9].mxu0  ;;  %v1150_v40 = vsel %vm329_vm2, %v1070_v38, -inf }
 0x583   :  { %1151 = vmax.xlane.f32.xlu0 %v1150_v40 }
 0x585   :  { %v1146_v41 = vpop.f32.mrb[10].mxu0 }
 0x586   :  { %v3092_v42 = vpop.f32.mrb[11].mxu0  ;;  %v1153_v43 = vsel %vm329_vm2, %v1146_v41, -inf }
 0x587   :  { %1154 = vmax.xlane.f32.xlu1 %v1153_v43 }
 0x610   :  { %v1152_v44 = vpop.xlane.xlu0 %1151 }
 0x611   :  { %v1156_v45 = vsub.f32 %v1070_v38, %v1152_v44  ;;  %v2831_v38 = vld [vmem:[%s3845_s8 + $0x2] ss:$0 sm:$0xff] }
 0x613   :  { %v1158_v46 = vmul.f32 1.442695, %v1156_v45 }
 0x614   :  { %v1155_v47 = vpop.xlane.xlu1 %1154 }
 0x615   :  { %3341 = vpow2.f32 %v1158_v46  ;;  %v1157_v48 = vsub.f32 %v1146_v41, %v1155_v47 }
 0x617   :  { %v1160_v49 = vmul.f32 1.442695, %v1157_v48 }
 0x619   :  { %3343 = vpow2.f32 %v1160_v49 }
 0x61f   :  { %v3342_v50 = vpop.eup %3341 }
 0x620   :  { %v1162_v51 = vsel %vm329_vm2, %v3342_v50, 0.0 }
 0x621   :  { %1163 = vadd.xlane.f32.xlu0 %v1162_v51 }
 0x623   :  { %v3344_v52 = vpop.eup %3343 }
 0x624   :  { %v1165_v53 = vsel %vm329_vm2, %v3344_v52, 0.0 }
 0x625   :  { %1166 = vadd.xlane.f32.xlu1 %v1165_v53 }
 0x6ae   :  { %v1164_v59 = vpop.xlane.xlu0 %1163 }
 0x6af   :  { %3345 = vrcp.f32 %v1164_v59 }
 0x6b2   :  { %v1167_v60 = vpop.xlane.xlu1 %1166 }
 0x6b3   :  { %3347 = vrcp.f32 %v1167_v60 }
 0x6b9   :  { %v3346_v61 = vpop.eup %3345 }
 0x6ba   :  { %v1170_v62 = vmul.f32 %v3346_v61, %v3342_v50 }
 0x6bc   :  { %3096 = vmatmul.mubr.msk.f32.vlgmr.msra.gmra.mrb[14].mxu1 %vm329_vm2, %v1170_v62  ;;  %v2840_v62 = vld [vmem:[%s3846_s9 + $0x10] sm:$0xff] }
 0x6bd   :  { %v3348_v63 = vpop.eup %3347  ;;  %3116 = vmatprep.mubr.msk.f32.mxu1 %vm63_vm0, %v3488_v13  ;;  %3275 = vmatpush3.bf16.msra.mxu1 %v3272_v7  ;;  %v3304_v7 = vpack.c.bf16 %v2852_v6, %v2851_v5  ;;  %v2759_v5 = vld [vmem:[%s3847_s10] ss:$0 sm:$0xff] }
 0x6be   :  { %v1171_v0 = vmul.f32 %v3348_v63, %v3344_v52  ;;  %3277 = vmatprep.subr.bf16.mxu1 %v3276_v10 }
 0x6c0   :  { %3101 = vmatmul.mubr.msk.f32.vlgmr.msra.gmra.mrb[12].mxu0 %vm329_vm2, %v1171_v0 }
 0x6c1   :  { %3104 = vmatpush3.msra.mxu0 %v2807_v1  ;;  %3279 = vmatpush3.bf16.msra.mxu1 %v3276_v10  ;;  %v2845_v10 = vld [vmem:[%s3840_s3 + $0x70] sm:$0xff] }
 0x6c2   :  { %3281 = vmatprep.subr.bf16.mxu0 %v3280_v4  ;;  %3289 = vmatprep.subr.bf16.mxu1 %v3288_v19  ;;  %v3300_v17 = vpack.c.bf16 %v2846_v12, %v2845_v10 }
 0x6c4   :  { %3117 = vmatmul.mubr.msk.f32.vlgmr.msra.gmra.mrb[16].mxu1 %vm63_vm0, %v3500_v15 }
 0x6c5   :  { %3138 = vmatprep.mubr.msk.f32.mxu1 %vm63_vm0, %v3540_v32  ;;  %3291 = vmatpush3.bf16.msra.mxu1 %v3288_v19  ;;  %v2854_v19 = vld [vmem:[%s3841_s4 + $0x78] sm:$0xff] }
 0x6c6   :  { %3293 = vmatprep.subr.bf16.mxu1 %v3292_v21  ;;  %v3308_v23 = vpack.c.bf16 %v2854_v19, %v2853_v18 }
 0x6c9   :  { %3295 = vmatpush3.bf16.msra.mxu1 %v3292_v21 }
 0x6ca   :  { %3146 = vmatprep.subr.mxu1 %v3389_v16 }
 0x6cc   :  { %3139 = vmatmul.mubr.msk.f32.vlgmr.msra.gmra.mrb[18].mxu1 %vm63_vm0, %v3547_v34 }
 0x6cd   :  { %3148 = vmatprep.mubr.msk.f32.mxu1 %vm3390_vm1, %v3389_v16 }
 0x78f   :  { %v1241_v22 = vpop.f32.mrb[14].mxu1 }
 0x790   :  { %v3097_v25 = vpop.f32.mrb[15].mxu1  ;;  %3105 = vmatprep.mubr.msk.f32.mxu0 %vm329_vm2, %v1241_v22 }
 0x791   :  { %v2856_v25 = vld [vmem:[%s3844_s7 + $0x3] ss:$0 sm:$0xff] }
 0x793   :  { %v1314_v27 = vpop.f32.mrb[12].mxu0 }
 0x794   :  { %v3102_v28 = vpop.f32.mrb[13].mxu0  ;;  %3106 = vmatmul.mubr.msk.f32.vlgmr.msra.gmra.mrb[4].mxu0 %vm329_vm2, %v1314_v27 }
 0x795   :  { %3283 = vmatpush3.bf16.msra.mxu0 %v3280_v4  ;;  %3127 = vmatprep.mubr.msk.f32.mxu0 %vm63_vm0, %v3481_v11 }
 0x796   :  { %3285 = vmatprep.subr.bf16.mxu0 %v3284_v26 }
 0x797   :  { %v3118_v29 = vpop.f32.mrb[16].mxu1 }
 0x798   :  { %v1482_v30 = vpop.f32.mrb[17].mxu1  ;;  %v1488_v42 = vadd.f32 %v3118_v29, %v2815_v36 }
 0x799   :  { %3287 = vmatpush3.bf16.msra.mxu0 %v3284_v26  ;;  %v1483_v43 = vadd.f32 %v2815_v36, %v1482_v30 }
 0x79a   :  { %3141 = vmatprep.subr.mxu0 %v3389_v16 }
 0x79c   :  { %3128 = vmatmul.mubr.msk.f32.vlgmr.msra.gmra.mrb[14].mxu0 %vm63_vm0, %v3495_v14 }
 0x79d   :  { %3143 = vmatprep.mubr.msk.f32.mxu0 %vm3390_vm1, %v3389_v16 }
 0x79f   :  { %v3140_v31 = vpop.f32.mrb[18].mxu1 }
 0x7a0   :  { %v1658_v33 = vpop.f32.mrb[19].mxu1  ;;  %v1664_v44 = vadd.f32 %v3140_v31, %v2831_v38  ;;  %v2859_v31 = vld [vmem:[%s3842_s5 + $0x60] sm:$0xff] }
 0x7a1   :  { %v1659_v45 = vadd.f32 %v2831_v38, %v1658_v33  ;;  %v2860_v33 = vld [vmem:[%s3842_s5 + $0x68] sm:$0xff] }
 0x7a2   :  { %v3312_v36 = vpack.c.bf16 %v2860_v33, %v2859_v31 }
 0x86f   :  { %v3129_v37 = vpop.f32.mrb[14].mxu0 }
 0x870   :  { %v1576_v39 = vadd.f32 %v3129_v37, %v2823_v35  ;;  %v1570_v40 = vpop.f32.mrb[15].mxu0  ;;  %v2862_v37 = vld [vmem:[%s3842_s5 + $0x78] sm:$0xff] }
 0x871   :  { %v1571_v41 = vadd.f32 %v2823_v35, %v1570_v40  ;;  %v2861_v35 = vld [vmem:[%s3842_s5 + $0x70] sm:$0xff] }
 0x872   :  { %3147 = vmatpush3.xpose.msk.msra.mxu1 %vm329_vm2, %v1576_v39  ;;  %v3316_v38 = vpack.c.bf16 %v2862_v37, %v2861_v35 }
 0x873   :  { %3142 = vmatpush3.xpose.msk.msra.mxu0 %vm329_vm2, %v1571_v41  ;;  %3156 = vmatprep.subr.mxu1 %v3389_v16 }
 0x874   :  { %3151 = vmatprep.subr.mxu0 %v3389_v16 }
 0x875   :  { %3149 = vmatmul.mubr.msk.f32.vlgmr.msra.gmra.mrb[20].mxu1 %vm329_vm2, %v1488_v42 }
 0x876   :  { %3144 = vmatmul.mubr.msk.f32.vlgmr.msra.gmra.mrb[16].mxu0 %vm329_vm2, %v1483_v43  ;;  %3157 = vmatpush3.msra.mxu1 %v1664_v44 }
 0x877   :  { %3152 = vmatpush3.msra.mxu0 %v1659_v45  ;;  %3158 = vmatprep.mubr.msk.f32.mxu1 %vm3390_vm1, %v3389_v16 }
 0x878   :  { %3153 = vmatprep.mubr.msk.f32.mxu0 %vm3390_vm1, %v3389_v16  ;;  %3161 = vmatprep.subr.mxu0 %v2840_v62 }
 0x948   :  { %v1815_v46 = vpop.f32.mrb[20].mxu1 }
 0x949   :  { %v1739_v47 = vpop.f32.mrb[16].mxu0  ;;  %v3150_v48 = vpop.f32.mrb[21].mxu1  ;;  %v1822_v49 = vsel %vm329_vm2, %v1815_v46, -inf }
 0x94a   :  { %1823 = vmax.xlane.f32.xlu1 %v1822_v49  ;;  %v3145_v50 = vpop.f32.mrb[17].mxu0  ;;  %v1819_v51 = vsel %vm329_vm2, %v1739_v47, -inf }
 0x94b   :  { %1820 = vmax.xlane.f32.xlu0 %v1819_v51 }
 0x9d7   :  { %v1824_v52 = vpop.xlane.xlu1 %1823 }
 0x9d8   :  { %v1826_v53 = vsub.f32 %v1815_v46, %v1824_v52  ;;  %v1821_v54 = vpop.xlane.xlu0 %1820 }
 0x9d9   :  { %v1825_v55 = vsub.f32 %v1739_v47, %v1821_v54  ;;  %v2864_v54 = vld [vmem:[%s3845_s8 + $0x3] ss:$0 sm:$0xff] }
 0x9da   :  { %v1829_v56 = vmul.f32 1.442695, %v1826_v53 }
 0x9db   :  { %v1827_v57 = vmul.f32 1.442695, %v1825_v55 }
 0x9dc   :  { %3349 = vpow2.f32 %v1829_v56 }
 0x9dd   :  { %3351 = vpow2.f32 %v1827_v57 }
 0x9e6   :  { %v3350_v58 = vpop.eup %3349 }
 0x9e7   :  { %v3352_v59 = vpop.eup %3351  ;;  %v1834_v60 = vsel %vm329_vm2, %v3350_v58, 0.0 }
 0x9e8   :  { %1835 = vadd.xlane.f32.xlu1 %v1834_v60  ;;  %v1831_v61 = vsel %vm329_vm2, %v3352_v59, 0.0 }
 0x9e9   :  { %1832 = vadd.xlane.f32.xlu0 %v1831_v61 }
 0xa75   :  { %v1836_v63 = vpop.xlane.xlu1 %1835 }
 0xa76   :  { %3353 = vrcp.f32 %v1836_v63  ;;  %v1833_v0 = vpop.xlane.xlu0 %1832 }
 0xa77   :  { %3355 = vrcp.f32 %v1833_v0  ;;  %v2873_v0 = vld [vmem:[%s3846_s9 + $0x18] sm:$0xff]  ;;  %s3365_s9 = scalar_lea.vmem %s2749_s23, 256 }
 0xa78   :  { %p3366_p0 = scmp.ne.s32.totalorder %s2749_s23, %s3365_s9  ;;  %p3371_p2 = scmp.lt.s32.totalorder %s3365_s9, %s3365_s9 }
 0xa7a   :  { %p3372_p3 = por %p3371_p2, %p3370_p1 }
 0xa7c   :  { %p3373_p4 = pnand %p3372_p3, %p3366_p0 }
 0xa80   :  { %v3354_v1 = vpop.eup %3353 }
 0xa81   :  { %v3356_v2 = vpop.eup %3355  ;;  %v1840_v3 = vmul.f32 %v3354_v1, %v3350_v58 }
 0xa82   :  { %v1839_v4 = vmul.f32 %v3356_v2, %v3352_v59 }
 0xa83   :  { %3159 = vmatmul.mubr.msk.f32.vlgmr.msra.gmra.mrb[22].mxu1 %vm329_vm2, %v1840_v3 }
 0xa84   :  { %3154 = vmatmul.mubr.msk.f32.vlgmr.msra.gmra.mrb[18].mxu0 %vm329_vm2, %v1839_v4  ;;  %3174 = vmatprep.mubr.msk.f32.mxu1 %vm63_vm0, %v3488_v13  ;;  %v3296_v13 = vpack.c.bf16 %v2844_v9, %v2843_v8 }
 0xa85   :  { %3162 = vmatpush3.msra.mxu0 %v2840_v62 }
 0xa86   :  { %3305 = vmatprep.subr.bf16.mxu0 %v3304_v7  ;;  %3297 = vmatprep.subr.bf16.mxu1 %v3296_v13 }
 0xa87   :  { %3299 = vmatpush3.bf16.msra.mxu1 %v3296_v13 }
 0xa88   :  { %3301 = vmatprep.subr.bf16.mxu1 %v3300_v17 }
 0xa8b   :  { %3303 = vmatpush3.bf16.msra.mxu1 %v3300_v17 }
 0xa8c   :  { %3313 = vmatprep.subr.bf16.mxu1 %v3312_v36 }
 0xa8e   :  { %3175 = vmatmul.mubr.msk.f32.vlgmr.msra.gmra.mrb[24].mxu1 %vm63_vm0, %v3500_v15 }
 0xa8f   :  { %3196 = vmatprep.mubr.msk.f32.mxu1 %vm63_vm0, %v3540_v32  ;;  %3315 = vmatpush3.bf16.msra.mxu1 %v3312_v36 }
 0xa90   :  { %3317 = vmatprep.subr.bf16.mxu1 %v3316_v38 }
 0xa93   :  { %3319 = vmatpush3.bf16.msra.mxu1 %v3316_v38 }
 0xa94   :  { %3209 = vmatprep.subr.mxu1 %v3389_v16 }
 0xa96   :  { %3197 = vmatmul.mubr.msk.f32.vlgmr.msra.gmra.mrb[26].mxu1 %vm63_vm0, %v3547_v34 }
 0xa97   :  { %3211 = vmatprep.mubr.msk.f32.mxu1 %vm3390_vm1, %v3389_v16 }
 0xb56   :  { %v1983_v20 = vpop.f32.mrb[22].mxu1 }
 0xb57   :  { %v1910_v21 = vpop.f32.mrb[18].mxu0  ;;  %v3160_v22 = vpop.f32.mrb[23].mxu1 }
 0xb58   :  { %v3155_v24 = vpop.f32.mrb[19].mxu0  ;;  %3163 = vmatprep.mubr.msk.f32.mxu0 %vm329_vm2, %v1910_v21 }
 0xb59   :  { %3164 = vmatmul.mubr.msk.f32.vlgmr.msra.gmra.mrb[4].mxu0 %vm329_vm2, %v1983_v20 }
 0xb5a   :  { %3307 = vmatpush3.bf16.msra.mxu0 %v3304_v7  ;;  %3185 = vmatprep.mubr.msk.f32.mxu0 %vm63_vm0, %v3481_v11  ;;  %v2848_v11 = vld [vmem:[%s3843_s6 + $0x3] ss:$0 sm:$0xff] }
 0xb5b   :  { %3309 = vmatprep.subr.bf16.mxu0 %v3308_v23 }
 0xb5e   :  { %3311 = vmatpush3.bf16.msra.mxu0 %v3308_v23 }
 0xb5f   :  { %3199 = vmatprep.subr.mxu0 %v3389_v16 }
 0xb61   :  { %3186 = vmatmul.mubr.msk.f32.vlgmr.msra.gmra.mrb[20].mxu0 %vm63_vm0, %v3495_v14  ;;  %v3176_v15 = vpop.f32.mrb[24].mxu1 }
 0xb62   :  { %3201 = vmatprep.mubr.msk.f32.mxu0 %vm3390_vm1, %v3389_v16  ;;  %v2151_v32 = vpop.f32.mrb[25].mxu1  ;;  %v2157_v30 = vadd.f32 %v3176_v15, %v2848_v11 }
 0xb63   :  { %v2152_v29 = vadd.f32 %v2848_v11, %v2151_v32 }
 0xb69   :  { %v3198_v53 = vpop.f32.mrb[26].mxu1 }
 0xb6a   :  { %v2327_v55 = vpop.f32.mrb[27].mxu1  ;;  %v2333_v57 = vadd.f32 %v3198_v53, %v2864_v54 }
 0xb6b   :  { %v2328_v56 = vadd.f32 %v2864_v54, %v2327_v55 }
 0xb6d   :  { %3210 = vmatpush3.msra.mxu1 %v2328_v56 }
 0xc34   :  { %v3187_v26 = vpop.f32.mrb[20].mxu0 }
 0xc35   :  { %v2239_v27 = vpop.f32.mrb[21].mxu0  ;;  %v2245_v14 = vadd.f32 %v3187_v26, %v2856_v25 }
 0xc36   :  { %v2240_v28 = vadd.f32 %v2856_v25, %v2239_v27 }
 0xc38   :  { %3200 = vmatpush3.xpose.msk.msra.mxu0 %vm329_vm2, %v2240_v28 }
 0xc39   :  { %3204 = vmatprep.subr.mxu0 %v3389_v16 }
 0xc3b   :  { %3202 = vmatmul.mubr.msk.f32.vlgmr.msra.gmra.mrb[22].mxu0 %vm329_vm2, %v2152_v29 }
 0xc3c   :  { %3205 = vmatpush3.xpose.msk.msra.mxu0 %vm329_vm2, %v2245_v14  ;;  %3206 = vmatprep.mubr.msk.f32.mxu0 %vm3390_vm1, %v3389_v16 }
 0xc3d   :  { %3214 = vmatprep.subr.mxu0 %v3389_v16 }
 0xc3f   :  { %3207 = vmatmul.mubr.msk.f32.vlgmr.msra.gmra.mrb[24].mxu0 %vm329_vm2, %v2157_v30 }
 0xc40   :  { %3216 = vmatprep.mubr.msk.f32.mxu0 %vm3390_vm1, %v3389_v16  ;;  %3215 = vmatpush3.msra.mxu0 %v2333_v57 }
 0xc41   :  { %3219 = vmatprep.subr.mxu0 %v2873_v0 }
 0xd0e   :  { %v2408_v39 = vpop.f32.mrb[22].mxu0 }
 0xd0f   :  { %v3203_v40 = vpop.f32.mrb[23].mxu0  ;;  %v2488_v41 = vsel %vm329_vm2, %v2408_v39, -inf }
 0xd10   :  { %2489 = vmax.xlane.f32.xlu0 %v2488_v41 }
 0xd12   :  { %v2484_v42 = vpop.f32.mrb[24].mxu0 }
 0xd13   :  { %v3208_v43 = vpop.f32.mrb[25].mxu0  ;;  %v2491_v44 = vsel %vm329_vm2, %v2484_v42, -inf }
 0xd14   :  { %2492 = vmax.xlane.f32.xlu1 %v2491_v44 }
 0xd9d   :  { %v2490_v45 = vpop.xlane.xlu0 %2489 }
 0xd9e   :  { %v2494_v46 = vsub.f32 %v2408_v39, %v2490_v45 }
 0xda0   :  { %v2496_v47 = vmul.f32 1.442695, %v2494_v46 }
 0xda1   :  { %v2493_v48 = vpop.xlane.xlu1 %2492 }
 0xda2   :  { %3357 = vpow2.f32 %v2496_v47  ;;  %v2495_v49 = vsub.f32 %v2484_v42, %v2493_v48 }
 0xda4   :  { %v2498_v34 = vmul.f32 1.442695, %v2495_v49 }
 0xda6   :  { %3359 = vpow2.f32 %v2498_v34 }
 0xdac   :  { %v3358_v50 = vpop.eup %3357 }
 0xdad   :  { %v2500_v16 = vsel %vm329_vm2, %v3358_v50, 0.0 }
 0xdae   :  { %2501 = vadd.xlane.f32.xlu0 %v2500_v16 }
 0xdb0   :  { %v3360_v51 = vpop.eup %3359 }
 0xdb1   :  { %v2503_v52 = vsel %vm329_vm2, %v3360_v51, 0.0 }
 0xdb2   :  { %2504 = vadd.xlane.f32.xlu1 %v2503_v52 }
 0xe3b   :  { %v2502_v58 = vpop.xlane.xlu0 %2501 }
 0xe3c   :  { %3361 = vrcp.f32 %v2502_v58 }
 0xe3f   :  { %v2505_v59 = vpop.xlane.xlu1 %2504 }
 0xe40   :  { %3363 = vrcp.f32 %v2505_v59 }
 0xe46   :  { %v3362_v60 = vpop.eup %3361 }
 0xe47   :  { %v2508_v61 = vmul.f32 %v3362_v60, %v3358_v50 }
 0xe49   :  { %3212 = vmatmul.mubr.msk.f32.vlgmr.msra.gmra.mrb[28].mxu1 %vm329_vm2, %v2508_v61 }
 0xe4a   :  { %v3364_v62 = vpop.eup %3363 }
 0xe4b   :  { %v2509_v63 = vmul.f32 %v3364_v62, %v3360_v51 }
 0xe4d   :  { %3217 = vmatmul.mubr.msk.f32.vlgmr.msra.gmra.mrb[26].mxu0 %vm329_vm2, %v2509_v63 }
 0xe4e   :  { %3220 = vmatpush3.msra.mxu0 %v2873_v0 }
 0xf1c   :  { %v2579_v1 = vpop.f32.mrb[28].mxu1 }
 0xf1d   :  { %v3213_v2 = vpop.f32.mrb[29].mxu1  ;;  %3221 = vmatprep.mubr.msk.f32.mxu0 %vm329_vm2, %v2579_v1 }
 0xf20   :  { %v2652_v3 = vpop.f32.mrb[26].mxu0 }
 0xf21   :  { %v3218_v4 = vpop.f32.mrb[27].mxu0  ;;  %3222 = vmatmul.mubr.msk.f32.vlgmr.msra.gmra.mrb[4].mxu0 %vm329_vm2, %v2652_v3 }
 0xff4   :  { %v3223_v6 = vpop.f32.mrb[4].mxu0 }
 0xff5   :  { %v3320_v7 = vadd.f32 %v3223_v6, %v2759_v5  ;;  %v2730_v8 = vpop.f32.mrb[5].mxu0 }
 0xff6   :  { %v3321_v9 = vadd.f32 %v2759_v5, %v2730_v8 }
 0xff7   :  { %2742 = vst.msk [vmem:[#allocation2 + $0x8] sm:$0xff] %vm63_vm0, %v3320_v7 }
 0xff8   :  { %2741 = vst.msk [vmem:[#allocation2] sm:$0xff] %vm63_vm0, %v3321_v9 }
 0xff9   :  { %3376 = shalt.err (!%p3373_p4)
}
 0xffa   :  { %s3377_s25 = scalar_lea.hbm %s3848_s11, 256 }
 0xffb   :  { %p3378_p5 = scmp.ne.s32.totalorder %s3848_s11, %s3377_s25  ;;  %p3381_p6 = scmp.lt.u32.totalorder %s3377_s25, %s3848_s11 }
 0xffd   :  { %p3383_p7 = pnand %p3381_p6, %p3378_p5 }
 0xfff   :  { %3386 = shalt.err (!%p3383_p7)
}
0x1000   :  { %s3392_s30 = smov 128   ;;  %s3393_s12 = smov 8  }
0x1001   :  { %2754 = dma.vmem_to_hbm [thread:$0]  %s2749_s23, 256, %s3848_s11, [#allocation3], %s3392_s30, %s3392_s30, %s3393_s12  }
0x1002   :  { %3387 = dma.done.wait [#allocation3], 256  }
0x1003   :  { %3388 = vsyncadd [#allocation3], 4294967040 }
0x1004   :  { %2758 = vsyncpa [#allocation3], 1 }

</bundles_post_ra>
